<compile_context>
chip_gen: v5e
topology: v5e:2x2
jax: 0.10.0
libtpu: 0.0.40
codegen_flags: <defaults>
</compile_context>

<pallas_src>
import functools

import jax
import jax.numpy as jnp
from jax import lax
from jax.experimental import pallas as pl
from jax.experimental.pallas import tpu as pltpu


# ---------------------------------------------------------------------------
# Fused kernel: BN(folded affine) -> ReLU -> 2x2 avg pool -> 1x1 conv (matmul)
# Grid: (batch, H-tile). One (1, TH, W, Cin) bf16 input tile per step.
# ---------------------------------------------------------------------------
def _transition_kernel(scale_ref, shift_ref, x_ref, w_ref, o_ref):
    x = x_ref[0].astype(jnp.float32)               # (TH, W, Cin) bf16 -> f32 in-vreg
    th, w, cin = x.shape
    cout = w_ref.shape[1]

    scale = scale_ref[...].reshape(1, 1, cin)      # folded BN affine (f32)
    shift = shift_ref[...].reshape(1, 1, cin)

    # BatchNorm + ReLU in f32 on the VPU (single fused elementwise expression).
    y = jnp.maximum(x * scale + shift, 0.0)        # (TH, W, Cin)

    # 2x2 average pool BEFORE the 1x1 conv (pool and 1x1 conv commute; ReLU is
    # already upstream of the conv).  Pairwise adds; the 0.25 scale is folded
    # into the conv weight in the wrapper.
    y4 = y.reshape(th // 2, 2, w, cin)             # split leading (non-vreg) axis
    rowsum = y4[:, 0] + y4[:, 1]                   # (TH//2, W, Cin)
    c4 = rowsum.reshape(th // 2, w // 2, 2, cin)
    pooled = c4[:, :, 0, :] + c4[:, :, 1, :]       # (TH//2, W//2, Cin)

    # 1x1 conv == matmul over channels. Feed MXU in bf16, accumulate in f32.
    # (Kept as an explicit 2-D reshape + jnp.dot: guaranteed to lower; any
    #  relayout copy here is hidden under the HBM-bound pipeline.)
    p2d = pooled.reshape((th // 2) * (w // 2), cin).astype(jnp.bfloat16)
    z = jnp.dot(p2d, w_ref[...], preferred_element_type=jnp.float32)
    o_ref[0] = z.reshape(th // 2, w // 2, cout).astype(o_ref.dtype)


# ---------------------------------------------------------------------------
# Generation-aware VMEM capacity (v7x has 64 MiB per TensorCore; v5e/v6e 128).
# ---------------------------------------------------------------------------
def _vmem_capacity_bytes():
    try:
        info = pltpu.get_tpu_info()
        cap = getattr(info, "vmem_capacity_bytes", None)
        if cap:
            return int(cap)
    except Exception:
        pass
    return 64 * 1024 * 1024  # conservative: safe on every generation


# ---------------------------------------------------------------------------
# H-tile selection: largest even tile dividing H whose estimated working set
# (double-buffered bf16 input + double-buffered f32 output + f32 BN/pool
# temporaries) fits the budget.  When N == 1, keep >= 2 H-tiles so both v7x
# TensorCores get parallel work.
# ---------------------------------------------------------------------------
def _pick_h_tile(n, h, w_dim, cin, cout, budget_bytes):
    def working_set(th):
        in_dbuf = 2 * th * w_dim * cin * 2                    # bf16, 2 buffers
        out_dbuf = 2 * (th // 2) * (w_dim // 2) * cout * 4    # f32, 2 buffers
        interm = 3 * th * w_dim * cin * 4                     # f32 temporaries
        return in_dbuf + out_dbuf + interm

    best = 2
    for cand in range(2, h + 1, 2):
        if h % cand:
            continue
        if n == 1 and cand > h // 2:       # keep >=2 parallel steps for megacore
            continue
        if working_set(cand) <= budget_bytes:
            best = cand
    return best


# ---------------------------------------------------------------------------
# Wrapper
# ---------------------------------------------------------------------------
@functools.partial(jax.jit, static_argnames=("eps",))
def transition_block_forward(x_nchw, conv_w, gamma, beta, eps=1e-5):
    n, cin, h, w = x_nchw.shape
    cout = conv_w.shape[0]
    assert h % 2 == 0 and w % 2 == 0, "AvgPool2d(2) path assumes even H, W"
    # TODO(synk): PyTorch AvgPool2d(2) floors odd H/W; only the even case is handled.

    # Channels onto the TPU lane axis, stored ONCE in bf16: this is the only
    # HBM copy of x the stats pass and the kernel touch (halves read traffic).
    x_nhwc = jnp.transpose(x_nchw.astype(jnp.float32), (0, 2, 3, 1)).astype(jnp.bfloat16)

    # BN batch statistics (training-mode, biased variance) from the bf16 copy:
    # one fused sum / sum-of-squares HBM pass, accumulated in f32.  (E[x^2] -
    # E[x]^2 in f32 is fine for activation-scale data; clamped at 0.)
    cnt = float(n * h * w)
    xf = x_nhwc.astype(jnp.float32)
    s1 = jnp.sum(xf, axis=(0, 1, 2))
    s2 = jnp.sum(xf * xf, axis=(0, 1, 2))
    mean = s1 / cnt
    var = jnp.maximum(s2 / cnt - mean * mean, 0.0)

    g32 = gamma.astype(jnp.float32)
    b32 = beta.astype(jnp.float32)
    inv_std = lax.rsqrt(var + eps)
    scale = (g32 * inv_std).reshape(1, cin)
    shift = (b32 - mean * g32 * inv_std).reshape(1, cin)

    # 1x1 conv weight (Cout, Cin, 1, 1) -> (Cin, Cout), bf16 for the MXU, with
    # the 0.25 average-pool scale folded in (exact: exponent shift only).
    w_mat = (0.25 * jnp.transpose(conv_w[:, :, 0, 0], (1, 0))).astype(jnp.bfloat16)

    # Generation-aware VMEM budget / limit (v7x: ~48 MiB limit, v5e/v6e: ~96).
    vmem_cap = _vmem_capacity_bytes()
    vmem_limit = int(min(vmem_cap * 3 // 4, 96 * 1024 * 1024))
    budget = vmem_limit // 2
    th = _pick_h_tile(n, h, w, cin, cout, budget)
    grid = (n, h // th)

    out_nhwc = pl.pallas_call(
        _transition_kernel,
        out_shape=jax.ShapeDtypeStruct((n, h // 2, w // 2, cout), jnp.float32),
        grid=grid,
        in_specs=[
            pl.BlockSpec((1, cin), lambda b, t: (0, 0)),               # scale
            pl.BlockSpec((1, cin), lambda b, t: (0, 0)),               # shift
            pl.BlockSpec((1, th, w, cin), lambda b, t: (b, t, 0, 0)),  # x tile (bf16)
            pl.BlockSpec((cin, cout), lambda b, t: (0, 0)),            # weight (bf16)
        ],
        out_specs=pl.BlockSpec((1, th // 2, w // 2, cout),
                               lambda b, t: (b, t, 0, 0)),
        compiler_params=pltpu.CompilerParams(
            dimension_semantics=("parallel", "parallel"),
            vmem_limit_bytes=vmem_limit),
    )(scale, shift, x_nhwc, w_mat)

    # Back to NCHW to match PyTorch output layout (tensor is 4x smaller here).
    return jnp.transpose(out_nhwc, (0, 3, 1, 2))


# ---------------------------------------------------------------------------
# Pure-JAX reference (f32 end-to-end) for a correctness check
# ---------------------------------------------------------------------------
def _reference(x_nchw, conv_w, gamma, beta, eps=1e-5):
    mean = jnp.mean(x_nchw, axis=(0, 2, 3), keepdims=True)
    var = jnp.var(x_nchw, axis=(0, 2, 3), keepdims=True)
    y = (x_nchw - mean) / jnp.sqrt(var + eps)
    y = y * gamma.reshape(1, -1, 1, 1) + beta.reshape(1, -1, 1, 1)
    y = jnp.maximum(y, 0.0)
    z = jnp.einsum("nchw,oc->nohw", y, conv_w[:, :, 0, 0])
    n, co, h, w = z.shape
    return z.reshape(n, co, h // 2, 2, w // 2, 2).mean(axis=(3, 5))


if __name__ == "__main__":
    key = jax.random.PRNGKey(0)
    k_x, k_w = jax.random.split(key)

    N, Cin, Cout, H, W = 2, 8, 4, 16, 16

    x = jax.random.normal(k_x, (N, Cin, H, W), dtype=jnp.float32)
    # Conv2d(in, out, 1, bias=False) weight, deterministic init
    conv_w = (jax.random.normal(k_w, (Cout, Cin, 1, 1), dtype=jnp.float32)
              * (1.0 / jnp.sqrt(Cin)))
    gamma = jnp.ones((Cin,), dtype=jnp.float32)   # BatchNorm2d default weight
    beta = jnp.zeros((Cin,), dtype=jnp.float32)   # BatchNorm2d default bias

    out = jax.block_until_ready(transition_block_forward(x, conv_w, gamma, beta))
    ref = _reference(x, conv_w, gamma, beta)

    assert out.shape == (N, Cout, H // 2, W // 2), out.shape
    # bf16 is used for the activation copy and at the MXU boundary (f32
    # accumulate everywhere), so compare against the full-f32 reference at
    # bf16-level tolerance.
    assert jnp.allclose(out, ref, atol=3e-2, rtol=3e-2), (
        float(jnp.max(jnp.abs(out - ref))))

    print("KERNEL_OK")
</pallas_src>

<mosaic_0001>
module attributes {stable_mosaic.version = 11 : i64} {
  func.func @_transition_kernel(%arg0: i32, %arg1: i32, %arg2: memref<1x8xf32, #tpu.memory_space<vmem>>, %arg3: memref<1x8xf32, #tpu.memory_space<vmem>>, %arg4: memref<1x16x16x8xbf16, #tpu.memory_space<vmem>>, %arg5: memref<8x4xbf16, #tpu.memory_space<vmem>>, %arg6: memref<1x8x8x4xf32, #tpu.memory_space<vmem>>) attributes {dimension_semantics = [#tpu.dimension_semantics<parallel>, #tpu.dimension_semantics<parallel>], iteration_bounds = array<i64: 2, 1>, scalar_prefetch = 0 : i64, scratch_operands = 0 : i64, tpu.core_type = #tpu.core_type<tc>, window_params = [{pipeline_mode = #tpu.pipeline_mode<synchronous>, transform_indices = @transform_0, window_bounds = array<i64: 1, 8>}, {pipeline_mode = #tpu.pipeline_mode<synchronous>, transform_indices = @transform_1, window_bounds = array<i64: 1, 8>}, {transform_indices = @transform_2, window_bounds = array<i64: 1, 16, 16, 8>}, {pipeline_mode = #tpu.pipeline_mode<synchronous>, transform_indices = @transform_3, window_bounds = array<i64: 8, 4>}, {transform_indices = @transform_4, window_bounds = array<i64: 1, 8, 8, 4>}]} {
    %c0 = arith.constant 0 : index
    %c0_0 = arith.constant 0 : index
    %c0_1 = arith.constant 0 : index
    %c0_2 = arith.constant 0 : index
    %0 = vector.load %arg4[%c0, %c0_0, %c0_1, %c0_2] : memref<1x16x16x8xbf16, #tpu.memory_space<vmem>>, vector<1x16x16x8xbf16>
    %1 = vector.shape_cast %0 : vector<1x16x16x8xbf16> to vector<16x16x8xbf16>
    %2 = arith.extf %1 : vector<16x16x8xbf16> to vector<16x16x8xf32>
    %c0_3 = arith.constant 0 : index
    %c0_4 = arith.constant 0 : index
    %3 = vector.load %arg2[%c0_3, %c0_4] : memref<1x8xf32, #tpu.memory_space<vmem>>, vector<1x8xf32>
    %4 = vector.shape_cast %3 : vector<1x8xf32> to vector<1x1x8xf32>
    %c0_5 = arith.constant 0 : index
    %c0_6 = arith.constant 0 : index
    %5 = vector.load %arg3[%c0_5, %c0_6] : memref<1x8xf32, #tpu.memory_space<vmem>>, vector<1x8xf32>
    %6 = vector.shape_cast %5 : vector<1x8xf32> to vector<1x1x8xf32>
    %7 = vector.broadcast %4 : vector<1x1x8xf32> to vector<16x16x8xf32>
    %8 = arith.mulf %2, %7 : vector<16x16x8xf32>
    %9 = vector.broadcast %6 : vector<1x1x8xf32> to vector<16x16x8xf32>
    %10 = arith.addf %8, %9 : vector<16x16x8xf32>
    %cst = arith.constant 0.000000e+00 : f32
    %11 = vector.broadcast %cst : f32 to vector<16x16x8xf32>
    %12 = arith.maximumf %10, %11 : vector<16x16x8xf32>
    %13 = vector.shape_cast %12 : vector<16x16x8xf32> to vector<8x2x16x8xf32>
    %14 = vector.extract_strided_slice %13 {offsets = [0, 0, 0, 0], sizes = [8, 1, 16, 8], strides = [1, 1, 1, 1]} : vector<8x2x16x8xf32> to vector<8x1x16x8xf32>
    %15 = vector.shape_cast %14 : vector<8x1x16x8xf32> to vector<8x16x8xf32>
    %16 = vector.extract_strided_slice %13 {offsets = [0, 1, 0, 0], sizes = [8, 1, 16, 8], strides = [1, 1, 1, 1]} : vector<8x2x16x8xf32> to vector<8x1x16x8xf32>
    %17 = vector.shape_cast %16 : vector<8x1x16x8xf32> to vector<8x16x8xf32>
    %18 = arith.addf %15, %17 : vector<8x16x8xf32>
    %19 = vector.shape_cast %18 : vector<8x16x8xf32> to vector<8x8x2x8xf32>
    %20 = vector.extract_strided_slice %19 {offsets = [0, 0, 0, 0], sizes = [8, 8, 1, 8], strides = [1, 1, 1, 1]} : vector<8x8x2x8xf32> to vector<8x8x1x8xf32>
    %21 = vector.shape_cast %20 : vector<8x8x1x8xf32> to vector<8x8x8xf32>
    %22 = vector.extract_strided_slice %19 {offsets = [0, 0, 1, 0], sizes = [8, 8, 1, 8], strides = [1, 1, 1, 1]} : vector<8x8x2x8xf32> to vector<8x8x1x8xf32>
    %23 = vector.shape_cast %22 : vector<8x8x1x8xf32> to vector<8x8x8xf32>
    %24 = arith.addf %21, %23 : vector<8x8x8xf32>
    %25 = vector.shape_cast %24 : vector<8x8x8xf32> to vector<64x8xf32>
    %26 = arith.truncf %25 : vector<64x8xf32> to vector<64x8xbf16>
    %c0_7 = arith.constant 0 : index
    %c0_8 = arith.constant 0 : index
    %27 = vector.load %arg5[%c0_7, %c0_8] : memref<8x4xbf16, #tpu.memory_space<vmem>>, vector<8x4xbf16>
    %cst_9 = arith.constant dense<0.000000e+00> : vector<64x4xf32>
    %28 = tpu.matmul %26, %27, %cst_9 {dimension_numbers = #tpu.dot_dimension_numbers<[1], [0], [0], [1], [0, 0, 1, 1], [], []>} : vector<64x8xbf16>, vector<8x4xbf16>, vector<64x4xf32> -> vector<64x4xf32>
    %29 = vector.shape_cast %28 : vector<64x4xf32> to vector<8x8x4xf32>
    %c0_10 = arith.constant 0 : index
    %c0_11 = arith.constant 0 : index
    %c0_12 = arith.constant 0 : index
    %c0_13 = arith.constant 0 : index
    %30 = vector.load %arg6[%c0_10, %c0_11, %c0_12, %c0_13] : memref<1x8x8x4xf32, #tpu.memory_space<vmem>>, vector<1x8x8x4xf32>
    %31 = vector.shape_cast %30 : vector<1x8x8x4xf32> to vector<8x8x4xf32>
    %32 = vector.shape_cast %29 : vector<8x8x4xf32> to vector<1x8x8x4xf32>
    tpu.vector_store %arg6[%c0_10, %c0_11, %c0_12, %c0_13], %32 {strides = array<i32>} : memref<1x8x8x4xf32, #tpu.memory_space<vmem>>, vector<1x8x8x4xf32>,
    return
  }
  func.func @transform_0(%arg0: i32, %arg1: i32) -> (i32, i32) {
    %c0_i32 = arith.constant 0 : i32
    %c0_i32_0 = arith.constant 0 : i32
    %c0_i32_1 = arith.constant 0 : i32
    return %c0_i32, %c0_i32_0 : i32, i32
  }
  func.func @transform_1(%arg0: i32, %arg1: i32) -> (i32, i32) {
    %c0_i32 = arith.constant 0 : i32
    %c0_i32_0 = arith.constant 0 : i32
    %c0_i32_1 = arith.constant 0 : i32
    return %c0_i32, %c0_i32_0 : i32, i32
  }
  func.func @transform_2(%arg0: i32, %arg1: i32) -> (i32, i32, i32, i32) {
    %c0_i32 = arith.constant 0 : i32
    %c0_i32_0 = arith.constant 0 : i32
    %c0_i32_1 = arith.constant 0 : i32
    return %arg0, %arg1, %c0_i32, %c0_i32_0 : i32, i32, i32, i32
  }
  func.func @transform_3(%arg0: i32, %arg1: i32) -> (i32, i32) {
    %c0_i32 = arith.constant 0 : i32
    %c0_i32_0 = arith.constant 0 : i32
    %c0_i32_1 = arith.constant 0 : i32
    return %c0_i32, %c0_i32_0 : i32, i32
  }
  func.func @transform_4(%arg0: i32, %arg1: i32) -> (i32, i32, i32, i32) {
    %c0_i32 = arith.constant 0 : i32
    %c0_i32_0 = arith.constant 0 : i32
    %c0_i32_1 = arith.constant 0 : i32
    return %arg0, %arg1, %c0_i32, %c0_i32_0 : i32, i32, i32, i32
  }
}

</mosaic_0001>

<bundles_post_ra>
// kernel: transition_block_forward.1
= control target key start
LH: loop header
LB: loop body
LE: loop exit
PB: predicated region body
PF: predicated region fallthrough
CT: control target
= control target key end

     0   :  { %s1492_s15 = smov 0   ;;  %s1494_s16 = smov 0   ;;  %s1730_s0 = inlined_call_operand.vmem [shape: f32[1,8], index: 0, kind: input, shape index: {}]   ;;  %s1731_s1 = inlined_call_operand.vmem [shape: f32[1,8], index: 1, kind: input, shape index: {}]   ;;  %s1732_s2 = inlined_call_operand.vmem [shape: bf16[2,16,16,8], index: 2, kind: input, shape index: {}]   ;;  %s1733_s3 = inlined_call_operand.vmem [shape: bf16[8,4], index: 3, kind: input, shape index: {}]   ;;  %s1734_s4 = inlined_call_operand.vmem [shape: f32[2,8,8,4], index: 4, kind: output, shape index: {}]  }
   0x1   :  { %s1496_s17 = smov 0  }
   0x2 LB: > { %s26_s18 = sadd.s32 1, %s1461_s16  ;;  %p1258_p0 = scmp.ge.s32.totalorder %s1465_s17, 1  ;;  %s1465_s17 = sphi %s1496_s17, %s14_s17   ;;  %s1461_s16 = sphi %s1494_s16, %s1736_s16   ;;  %s1457_s15 = sphi %s1492_s15, %s1735_s15  }
   0x3   : > { %p28_p1 = scmp.ge.s32.totalorder %s26_s18, 2  ;;  %p184_p2 = scmp.lt.s32.totalorder %s1465_s17, 3 }
   0x5   : > { %s1738_s18 = smov (%p28_p1, %s26_s18), 0  ;;  %p185_p3 = pnand %p1258_p0, %p184_p2 }
   0x6   : > { %p220_p4 = scmp.lt.s32.totalorder (!%p185_p3), %s1457_s15, 1 }
   0x7   : > { %188 = sbr.rel (%p185_p3) target bundleno = 305 (0x131), region = 36 }
   0xc   : > { %v857_v0 = vld [vmem:[%s1733_s3] sm:$0xf]  ;;  %vm1122_vm0 = vcmask 1043456   ;;  %s1740_s15 = smov (!%p220_p4, %s1457_s15), 1  ;;  %vm987_vm1 = vcmask 1041409   ;;  %vm990_vm2 = vcmask 1042434  }
   0xd   : > { %v1124_v1 = vsel %vm1122_vm0, %v857_v0, 0  ;;  %s1333_s21 = sshll.u32 %s1740_s15, 7  ;;  %v1524_v2 = vld [vmem:[%s1730_s0] ss:$0 sm:$0xff]  ;;  %vm993_vm3 = vcmask 1043459   ;;  %vm996_vm4 = vcmask 1044484  }
   0xe   : > { %1133 = vmatpush.bf16.msra.mxu0 %v1124_v1  ;;  %1414 = vmatpush.bf16.msra.mxu1 %v1124_v1  ;;  %s1519_s24 = scalar_lea.vmem %s1732_s2, %s1333_s21  ;;  %v1533_v11 = vld [vmem:[%s1731_s1] ss:$0 sm:$0xff]  ;;  %vm999_vm5 = vcmask 1045509   ;;  %vm1002_vm6 = vcmask 1046534   ;;  %vm1005_vm7 = vcmask 1047559   ;;  %vm1109_vm8 = vcmask 64512  }
   0xf   : > { %1415 = vmatpush.bf16.msra.mxu2 %v1124_v1  ;;  %1416 = vmatpush.bf16.msra.mxu3 %v1124_v1  ;;  %v1336_v3 = vld [vmem:[%s1519_s24] sm:$0xff]   ;;  %v1399_v4 = vld [vmem:[%s1519_s24 + $0x8] sm:$0xff]   ;;  %v1400_v5 = vld [vmem:[%s1519_s24 + $0x10] sm:$0xff]   ;;  %s1334_s29 = sshll.u32 %s1740_s15, 6  ;;  %vm1155_vm9 = vcmask 31744  }
  0x10   : > { %v1337_v6 = vunpack.c.l.bf16 %v1336_v3  ;;  %v1338_v7 = vunpack.c.h.bf16 %v1336_v3  ;;  %v1341_v8 = vunpack.c.l.bf16 %v1399_v4  ;;  %v1342_v9 = vunpack.c.h.bf16 %v1399_v4  ;;  %v1401_v10 = vld [vmem:[%s1519_s24 + $0x18] sm:$0xff]   ;;  %s238_s6 = scalar_lea.vmem %s1734_s4, %s1334_s29 }
  0x11   : > { %v1345_v12 = vunpack.c.l.bf16 %v1400_v5  ;;  %v1346_v13 = vunpack.c.h.bf16 %v1400_v5  ;;  %v1349_v14 = vunpack.c.l.bf16 %v1401_v10  ;;  %v1350_v15 = vunpack.c.h.bf16 %v1401_v10 }
  0x12   : > { %v310_v16 = vmul.f32 %v1524_v2, %v1337_v6  ;;  %v311_v17 = vmul.f32 %v1524_v2, %v1338_v7  ;;  %v312_v18 = vmul.f32 %v1524_v2, %v1341_v8  ;;  %v313_v19 = vmul.f32 %v1524_v2, %v1342_v9 }
  0x13   : > { %v314_v20 = vmul.f32 %v1524_v2, %v1345_v12  ;;  %v315_v21 = vmul.f32 %v1524_v2, %v1346_v13  ;;  %v316_v22 = vmul.f32 %v1524_v2, %v1349_v14  ;;  %v317_v23 = vmul.f32 %v1524_v2, %v1350_v15 }
  0x14   : > { %v345_v24 = vadd.f32 %v1533_v11, %v310_v16  ;;  %v346_v25 = vadd.f32 %v1533_v11, %v311_v17  ;;  %v347_v26 = vadd.f32 %v1533_v11, %v312_v18  ;;  %v348_v27 = vadd.f32 %v1533_v11, %v313_v19 }
  0x15   : > { %v349_v28 = vadd.f32 %v1533_v11, %v314_v20  ;;  %v350_v29 = vadd.f32 %v1533_v11, %v315_v21  ;;  %v351_v30 = vadd.f32 %v1533_v11, %v316_v22  ;;  %v352_v31 = vadd.f32 %v1533_v11, %v317_v23 }
  0x16   : > { %v377_v32 = vmax.f32 %v345_v24, 0.0  ;;  %v378_v33 = vmax.f32 %v346_v25, 0.0  ;;  %v379_v34 = vmax.f32 %v347_v26, 0.0  ;;  %v380_v35 = vmax.f32 %v348_v27, 0.0 }
  0x17   : > { %v381_v36 = vmax.f32 %v349_v28, 0.0  ;;  %v382_v37 = vmax.f32 %v350_v29, 0.0  ;;  %v383_v38 = vmax.f32 %v351_v30, 0.0  ;;  %v384_v39 = vmax.f32 %v352_v31, 0.0 }
  0x18   : > { %v409_v40 = vadd.f32 %v379_v34, %v377_v32  ;;  %v410_v41 = vadd.f32 %v380_v35, %v378_v33 }
  0x19   : > { %v411_v42 = vadd.f32 %v383_v38, %v381_v36  ;;  %v412_v43 = vadd.f32 %v384_v39, %v382_v37 }
  0x1a   : > { %v441_v44 = vrot.slane %v409_v40, 2  ;;  %v442_v45 = vrot.slane %v409_v40, 4  ;;  %v443_v46 = vrot.slane %v409_v40, 6  ;;  %v444_v47 = vrot.slane %v410_v41, 2 }
  0x1b   : > { %v445_v48 = vrot.slane %v410_v41, 4  ;;  %v446_v49 = vrot.slane %v410_v41, 6  ;;  %v447_v50 = vrot.slane %v411_v42, 2  ;;  %v448_v51 = vrot.slane %v411_v42, 4 }
  0x1c   : > { %v449_v52 = vrot.slane %v411_v42, 6  ;;  %v450_v53 = vrot.slane %v412_v43, 2  ;;  %v451_v54 = vrot.slane %v412_v43, 4  ;;  %v452_v55 = vrot.slane %v412_v43, 6 }
  0x1d   : > { %v1263_v56 = vrot.slane %v409_v40, 9  ;;  %v1264_v57 = vrot.slane %v441_v44, 9  ;;  %v1265_v58 = vrot.slane %v442_v45, 9  ;;  %v1266_v59 = vrot.slane %v443_v46, 9 }
  0x1e   : > { %v1267_v60 = vrot.slane %v410_v41, 9  ;;  %v1268_v61 = vrot.slane %v444_v47, 9  ;;  %v1269_v62 = vrot.slane %v445_v48, 9  ;;  %v1270_v63 = vrot.slane %v446_v49, 9 }
  0x1f   : > { %v1271_v0 = vrot.slane %v411_v42, 9  ;;  %v1272_v1 = vrot.slane %v447_v50, 9  ;;  %v1273_v3 = vrot.slane %v448_v51, 9  ;;  %v1274_v4 = vrot.slane %v449_v52, 9 }
  0x20   : > { %v1275_v5 = vrot.slane %v412_v43, 9  ;;  %v1276_v6 = vrot.slane %v450_v53, 9  ;;  %v1277_v7 = vrot.slane %v451_v54, 9  ;;  %v1278_v8 = vrot.slane %v452_v55, 9 }
  0x21   : > { %v729_v9 = vadd.f32 %v1263_v56, %v409_v40  ;;  %v730_v10 = vadd.f32 %v1264_v57, %v441_v44  ;;  %v731_v12 = vadd.f32 %v1265_v58, %v442_v45  ;;  %v732_v13 = vadd.f32 %v1266_v59, %v443_v46 }
  0x22   : > { %v733_v14 = vadd.f32 %v1267_v60, %v410_v41  ;;  %v734_v15 = vadd.f32 %v1268_v61, %v444_v47  ;;  %v735_v16 = vadd.f32 %v1269_v62, %v445_v48  ;;  %v736_v17 = vadd.f32 %v1270_v63, %v446_v49 }
  0x23   : > { %v737_v18 = vadd.f32 %v1271_v0, %v411_v42  ;;  %v738_v19 = vadd.f32 %v1272_v1, %v447_v50  ;;  %v739_v20 = vadd.f32 %v1273_v3, %v448_v51  ;;  %v740_v21 = vadd.f32 %v1274_v4, %v449_v52 }
  0x24   : > { %v741_v22 = vadd.f32 %v1275_v5, %v412_v43  ;;  %v742_v23 = vadd.f32 %v1276_v6, %v450_v53  ;;  %v743_v24 = vadd.f32 %v1277_v7, %v451_v54  ;;  %v744_v25 = vadd.f32 %v1278_v8, %v452_v55  ;;  %v1402_v6 = vld [vmem:[%s1519_s24 + $0x20] sm:$0xff]  }
  0x25   : > { %v793_v26 = vpack.c.bf16 %v729_v9, %v729_v9  ;;  %v794_v27 = vpack.c.bf16 %v730_v10, %v730_v10  ;;  %v795_v28 = vpack.c.bf16 %v731_v12, %v731_v12  ;;  %v796_v29 = vpack.c.bf16 %v732_v13, %v732_v13  ;;  %v1403_v12 = vld [vmem:[%s1519_s24 + $0x28] sm:$0xff]  }
  0x26   : > { %v797_v30 = vpack.c.bf16 %v733_v14, %v733_v14  ;;  %v798_v31 = vpack.c.bf16 %v734_v15, %v734_v15  ;;  %v799_v32 = vpack.c.bf16 %v735_v16, %v735_v16  ;;  %v800_v33 = vpack.c.bf16 %v736_v17, %v736_v17  ;;  %v1404_v16 = vld [vmem:[%s1519_s24 + $0x30] sm:$0xff]  }
  0x27   : > { %v801_v34 = vpack.c.bf16 %v737_v18, %v737_v18  ;;  %v802_v35 = vpack.c.bf16 %v738_v19, %v738_v19  ;;  %v803_v36 = vpack.c.bf16 %v739_v20, %v739_v20  ;;  %v804_v37 = vpack.c.bf16 %v740_v21, %v740_v21  ;;  %v1405_v21 = vld [vmem:[%s1519_s24 + $0x38] sm:$0xff]  }
  0x28   : > { %v805_v38 = vpack.c.bf16 %v741_v22, %v741_v22  ;;  %v806_v39 = vpack.c.bf16 %v742_v23, %v742_v23  ;;  %v807_v40 = vpack.c.bf16 %v743_v24, %v743_v24  ;;  %v808_v41 = vpack.c.bf16 %v744_v25, %v744_v25 }
  0x29   : > { %v922_v42 = vunpack.c.l.b16 %v793_v26  ;;  %v923_v43 = vunpack.c.l.b16 %v794_v27  ;;  %v924_v44 = vunpack.c.l.b16 %v795_v28  ;;  %v925_v45 = vunpack.c.l.b16 %v796_v29 }
  0x2a   : > { %v926_v46 = vunpack.c.l.b16 %v797_v30  ;;  %v927_v47 = vunpack.c.l.b16 %v798_v31  ;;  %v928_v48 = vunpack.c.l.b16 %v799_v32  ;;  %v929_v49 = vunpack.c.l.b16 %v800_v33 }
  0x2b   : > { %v930_v50 = vunpack.c.l.b16 %v801_v34  ;;  %v931_v51 = vunpack.c.l.b16 %v802_v35  ;;  %v932_v52 = vunpack.c.l.b16 %v803_v36  ;;  %v933_v53 = vunpack.c.l.b16 %v804_v37 }
  0x2c   : > { %v934_v54 = vunpack.c.l.b16 %v805_v38  ;;  %v935_v55 = vunpack.c.l.b16 %v806_v39  ;;  %v936_v56 = vunpack.c.l.b16 %v807_v40  ;;  %v937_v57 = vunpack.c.l.b16 %v808_v41 }
  0x2d   : > { %v986_v58 = vrot.slane %v923_v43, 7  ;;  %v989_v59 = vrot.slane %v924_v44, 6  ;;  %v992_v60 = vrot.slane %v925_v45, 5  ;;  %v995_v61 = vrot.slane %v926_v46, 4 }
  0x2e   : > { %v998_v62 = vrot.slane %v927_v47, 3  ;;  %v1001_v63 = vrot.slane %v928_v48, 2  ;;  %v1004_v0 = vrot.slane %v929_v49, 1  ;;  %v1007_v3 = vrot.slane %v931_v51, 7 }
  0x2f   : > { %v988_v1 = vsel %vm987_vm1, %v986_v58, %v922_v42  ;;  %v1009_v4 = vrot.slane %v932_v52, 6  ;;  %v1011_v5 = vrot.slane %v933_v53, 5  ;;  %v1013_v8 = vrot.slane %v934_v54, 4 }
  0x30   : > { %v991_v7 = vsel %vm990_vm2, %v989_v59, %v988_v1  ;;  %v1015_v9 = vrot.slane %v935_v55, 3  ;;  %v1017_v10 = vrot.slane %v936_v56, 2  ;;  %v1008_v14 = vsel %vm987_vm1, %v1007_v3, %v930_v50  ;;  %v1583_v50 = vld [vmem:[%s1519_s24 + $0x40] sm:$0xff]   ;;  %v1590_v55 = vld [vmem:[%s1519_s24 + $0x48] sm:$0xff]  }
  0x31   : > { %v994_v13 = vsel %vm993_vm3, %v992_v60, %v991_v7  ;;  %v1019_v15 = vrot.slane %v937_v57, 1  ;;  %v1010_v18 = vsel %vm990_vm2, %v1009_v4, %v1008_v14  ;;  %v1353_v19 = vunpack.c.l.bf16 %v1402_v6  ;;  %v1593_v60 = vld [vmem:[%s1519_s24 + $0x50] sm:$0xff]  }
  0x32   : > { %v997_v17 = vsel %vm996_vm4, %v995_v61, %v994_v13  ;;  %v1354_v20 = vunpack.c.h.bf16 %v1402_v6  ;;  %v1012_v23 = vsel %vm993_vm3, %v1011_v5, %v1010_v18  ;;  %v1357_v24 = vunpack.c.l.bf16 %v1403_v12 }
  0x33   : > { %v1000_v22 = vsel %vm999_vm5, %v998_v62, %v997_v17  ;;  %v1358_v25 = vunpack.c.h.bf16 %v1403_v12  ;;  %v1014_v27 = vsel %vm996_vm4, %v1013_v8, %v1012_v23  ;;  %v1361_v28 = vunpack.c.l.bf16 %v1404_v16 }
  0x34   : > { %v1003_v26 = vsel %vm1002_vm6, %v1001_v63, %v1000_v22  ;;  %v1362_v29 = vunpack.c.h.bf16 %v1404_v16  ;;  %v1016_v31 = vsel %vm999_vm5, %v1015_v9, %v1014_v27  ;;  %v1365_v32 = vunpack.c.l.bf16 %v1405_v21 }
  0x35   : > { %v1006_v30 = vsel %vm1005_vm7, %v1004_v0, %v1003_v26  ;;  %v1366_v33 = vunpack.c.h.bf16 %v1405_v21  ;;  %v1018_v34 = vsel %vm1002_vm6, %v1017_v10, %v1016_v31  ;;  %v318_v35 = vmul.f32 %v1524_v2, %v1353_v19 }
  0x36   : > { %v319_v36 = vmul.f32 %v1524_v2, %v1354_v20  ;;  %v320_v37 = vmul.f32 %v1524_v2, %v1357_v24  ;;  %v1020_v38 = vsel %vm1005_vm7, %v1019_v15, %v1018_v34  ;;  %v321_v39 = vmul.f32 %v1524_v2, %v1358_v25 }
  0x37   : > { %v322_v40 = vmul.f32 %v1524_v2, %v1361_v28  ;;  %v323_v41 = vmul.f32 %v1524_v2, %v1362_v29  ;;  %v1105_v42 = vpack.c.b16 %v1020_v38, %v1006_v30  ;;  %v324_v43 = vmul.f32 %v1524_v2, %v1365_v32 }
  0x38   : > { %v325_v44 = vmul.f32 %v1524_v2, %v1366_v33  ;;  %v353_v45 = vadd.f32 %v1533_v11, %v318_v35  ;;  %v354_v46 = vadd.f32 %v1533_v11, %v319_v36  ;;  %v355_v47 = vadd.f32 %v1533_v11, %v320_v37 }
  0x39   : > { %v356_v48 = vadd.f32 %v1533_v11, %v321_v39  ;;  %v357_v49 = vadd.f32 %v1533_v11, %v322_v40  ;;  %1327 = vmatmul.msk.bf16.vlgmr.msra.gmra.mxu0 %vm1109_vm8, %v1105_v42  ;;  %v358_v51 = vadd.f32 %v1533_v11, %v323_v41  ;;  %v359_v52 = vadd.f32 %v1533_v11, %v324_v43 }
  0x3a   : > { %v360_v53 = vadd.f32 %v1533_v11, %v325_v44  ;;  %v385_v54 = vmax.f32 %v353_v45, 0.0  ;;  %v386_v56 = vmax.f32 %v354_v46, 0.0  ;;  %v387_v57 = vmax.f32 %v355_v47, 0.0 }
  0x3b   : > { %v388_v58 = vmax.f32 %v356_v48, 0.0  ;;  %v389_v59 = vmax.f32 %v357_v49, 0.0  ;;  %v390_v61 = vmax.f32 %v358_v51, 0.0  ;;  %v391_v62 = vmax.f32 %v359_v52, 0.0 }
  0x3c   : > { %v392_v63 = vmax.f32 %v360_v53, 0.0  ;;  %v1369_v0 = vunpack.c.l.bf16 %v1583_v50  ;;  %v413_v1 = vadd.f32 %v387_v57, %v385_v54  ;;  %v1370_v4 = vunpack.c.h.bf16 %v1583_v50 }
  0x3d   : > { %v414_v3 = vadd.f32 %v388_v58, %v386_v56  ;;  %v1373_v5 = vunpack.c.l.bf16 %v1590_v55  ;;  %v415_v6 = vadd.f32 %v391_v62, %v389_v59  ;;  %v1374_v8 = vunpack.c.h.bf16 %v1590_v55 }
  0x3e   : > { %v416_v7 = vadd.f32 %v392_v63, %v390_v61  ;;  %v1377_v9 = vunpack.c.l.bf16 %v1593_v60  ;;  %v453_v10 = vrot.slane %v413_v1, 2  ;;  %v454_v12 = vrot.slane %v413_v1, 4 }
  0x3f   : > { %v455_v13 = vrot.slane %v413_v1, 6  ;;  %v456_v14 = vrot.slane %v414_v3, 2  ;;  %v457_v15 = vrot.slane %v414_v3, 4  ;;  %v458_v16 = vrot.slane %v414_v3, 6 }
  0x40   : > { %v459_v17 = vrot.slane %v415_v6, 2  ;;  %v460_v18 = vrot.slane %v415_v6, 4  ;;  %v461_v19 = vrot.slane %v415_v6, 6  ;;  %v462_v20 = vrot.slane %v416_v7, 2 }
  0x41   : > { %v463_v21 = vrot.slane %v416_v7, 4  ;;  %v464_v22 = vrot.slane %v416_v7, 6  ;;  %v1279_v23 = vrot.slane %v413_v1, 9  ;;  %v1280_v24 = vrot.slane %v453_v10, 9 }
  0x42   : > { %v1281_v25 = vrot.slane %v454_v12, 9  ;;  %v1282_v26 = vrot.slane %v455_v13, 9  ;;  %v1283_v27 = vrot.slane %v414_v3, 9  ;;  %v1284_v28 = vrot.slane %v456_v14, 9 }
  0x43   : > { %v1285_v29 = vrot.slane %v457_v15, 9  ;;  %v1286_v30 = vrot.slane %v458_v16, 9  ;;  %v1287_v31 = vrot.slane %v415_v6, 9  ;;  %v1288_v32 = vrot.slane %v459_v17, 9 }
  0x44   : > { %v1289_v33 = vrot.slane %v460_v18, 9  ;;  %v1290_v34 = vrot.slane %v461_v19, 9  ;;  %v1291_v35 = vrot.slane %v416_v7, 9  ;;  %v1292_v36 = vrot.slane %v462_v20, 9 }
  0x45   : > { %v1293_v37 = vrot.slane %v463_v21, 9  ;;  %v1294_v38 = vrot.slane %v464_v22, 9  ;;  %v745_v39 = vadd.f32 %v1279_v23, %v413_v1  ;;  %v746_v40 = vadd.f32 %v1280_v24, %v453_v10 }
  0x46   : > { %v747_v41 = vadd.f32 %v1281_v25, %v454_v12  ;;  %v748_v42 = vadd.f32 %v1282_v26, %v455_v13  ;;  %v749_v43 = vadd.f32 %v1283_v27, %v414_v3  ;;  %v750_v44 = vadd.f32 %v1284_v28, %v456_v14 }
  0x47   : > { %v751_v45 = vadd.f32 %v1285_v29, %v457_v15  ;;  %v752_v46 = vadd.f32 %v1286_v30, %v458_v16  ;;  %v753_v47 = vadd.f32 %v1287_v31, %v415_v6  ;;  %v754_v48 = vadd.f32 %v1288_v32, %v459_v17 }
  0x48   : > { %v755_v49 = vadd.f32 %v1289_v33, %v460_v18  ;;  %v756_v51 = vadd.f32 %v1290_v34, %v461_v19  ;;  %v757_v52 = vadd.f32 %v1291_v35, %v416_v7  ;;  %v758_v53 = vadd.f32 %v1292_v36, %v462_v20 }
  0x49   : > { %v759_v54 = vadd.f32 %v1293_v37, %v463_v21  ;;  %v760_v56 = vadd.f32 %v1294_v38, %v464_v22  ;;  %v809_v57 = vpack.c.bf16 %v745_v39, %v745_v39  ;;  %v810_v58 = vpack.c.bf16 %v746_v40, %v746_v40 }
  0x4a   : > { %v811_v59 = vpack.c.bf16 %v747_v41, %v747_v41  ;;  %v812_v61 = vpack.c.bf16 %v748_v42, %v748_v42  ;;  %v813_v62 = vpack.c.bf16 %v749_v43, %v749_v43  ;;  %v814_v63 = vpack.c.bf16 %v750_v44, %v750_v44 }
  0x4b   : > { %v815_v1 = vpack.c.bf16 %v751_v45, %v751_v45  ;;  %v816_v10 = vpack.c.bf16 %v752_v46, %v752_v46  ;;  %v817_v3 = vpack.c.bf16 %v753_v47, %v753_v47  ;;  %v818_v12 = vpack.c.bf16 %v754_v48, %v754_v48  ;;  %v1409_v45 = vld [vmem:[%s1519_s24 + $0x58] sm:$0xff]  }
  0x4c   : > { %v819_v13 = vpack.c.bf16 %v755_v49, %v755_v49  ;;  %v820_v14 = vpack.c.bf16 %v756_v51, %v756_v51  ;;  %v821_v6 = vpack.c.bf16 %v757_v52, %v757_v52  ;;  %v822_v15 = vpack.c.bf16 %v758_v53, %v758_v53 }
  0x4d   : > { %v823_v16 = vpack.c.bf16 %v759_v54, %v759_v54  ;;  %v824_v17 = vpack.c.bf16 %v760_v56, %v760_v56  ;;  %v938_v7 = vunpack.c.l.b16 %v809_v57  ;;  %v939_v18 = vunpack.c.l.b16 %v810_v58 }
  0x4e   : > { %v940_v19 = vunpack.c.l.b16 %v811_v59  ;;  %v941_v20 = vunpack.c.l.b16 %v812_v61  ;;  %v942_v21 = vunpack.c.l.b16 %v813_v62  ;;  %v943_v22 = vunpack.c.l.b16 %v814_v63 }
  0x4f   : > { %v944_v23 = vunpack.c.l.b16 %v815_v1  ;;  %v945_v24 = vunpack.c.l.b16 %v816_v10  ;;  %v946_v25 = vunpack.c.l.b16 %v817_v3  ;;  %v947_v26 = vunpack.c.l.b16 %v818_v12 }
  0x50   : > { %v948_v27 = vunpack.c.l.b16 %v819_v13  ;;  %v949_v28 = vunpack.c.l.b16 %v820_v14  ;;  %v950_v29 = vunpack.c.l.b16 %v821_v6  ;;  %v951_v30 = vunpack.c.l.b16 %v822_v15 }
  0x51   : > { %v952_v31 = vunpack.c.l.b16 %v823_v16  ;;  %v953_v32 = vunpack.c.l.b16 %v824_v17  ;;  %v1021_v33 = vrot.slane %v939_v18, 7  ;;  %v1023_v34 = vrot.slane %v940_v19, 6 }
  0x52   : > { %v1025_v35 = vrot.slane %v941_v20, 5  ;;  %v1027_v36 = vrot.slane %v942_v21, 4  ;;  %v1029_v37 = vrot.slane %v943_v22, 3  ;;  %v1031_v38 = vrot.slane %v944_v23, 2  ;;  %v1643_v20 = vld [vmem:[%s1519_s24 + $0x60] sm:$0xff]  }
  0x53   : > { %v1033_v39 = vrot.slane %v945_v24, 1  ;;  %v1035_v40 = vrot.slane %v947_v26, 7  ;;  %v1022_v41 = vsel %vm987_vm1, %v1021_v33, %v938_v7  ;;  %v1037_v42 = vrot.slane %v948_v27, 6 }
  0x54   : > { %v1039_v43 = vrot.slane %v949_v28, 5  ;;  %v1041_v44 = vrot.slane %v950_v29, 4  ;;  %v1024_v46 = vsel %vm990_vm2, %v1023_v34, %v1022_v41  ;;  %v1043_v48 = vrot.slane %v951_v30, 3 }
  0x55   : > { %v1036_v47 = vsel %vm987_vm1, %v1035_v40, %v946_v25  ;;  %v1045_v49 = vrot.slane %v952_v31, 2  ;;  %v1026_v51 = vsel %vm993_vm3, %v1025_v35, %v1024_v46  ;;  %v1047_v53 = vrot.slane %v953_v32, 1  ;;  %v1647_v25 = vld [vmem:[%s1519_s24 + $0x68] sm:$0xff]  }
  0x56   : > { %v1038_v52 = vsel %vm990_vm2, %v1037_v42, %v1036_v47  ;;  %v1378_v54 = vunpack.c.h.bf16 %v1593_v60  ;;  %v1028_v56 = vsel %vm996_vm4, %v1027_v36, %v1026_v51  ;;  %v1381_v58 = vunpack.c.l.bf16 %v1409_v45 }
  0x57   : > { %v1040_v57 = vsel %vm993_vm3, %v1039_v43, %v1038_v52  ;;  %v1382_v59 = vunpack.c.h.bf16 %v1409_v45  ;;  %v1030_v61 = vsel %vm999_vm5, %v1029_v37, %v1028_v56  ;;  %v326_v63 = vmul.f32 %v1524_v2, %v1369_v0 }
  0x58   : > { %v1042_v62 = vsel %vm996_vm4, %v1041_v44, %v1040_v57  ;;  %v327_v1 = vmul.f32 %v1524_v2, %v1370_v4  ;;  %v1032_v10 = vsel %vm1002_vm6, %v1031_v38, %v1030_v61  ;;  %v328_v12 = vmul.f32 %v1524_v2, %v1373_v5 }
  0x59   : > { %v1044_v3 = vsel %vm999_vm5, %v1043_v48, %v1042_v62  ;;  %v329_v13 = vmul.f32 %v1524_v2, %v1374_v8  ;;  %v1034_v14 = vsel %vm1005_vm7, %v1033_v39, %v1032_v10  ;;  %v330_v50 = vmul.f32 %v1524_v2, %v1377_v9 }
  0x5a   : > { %v1046_v0 = vsel %vm1002_vm6, %v1045_v49, %v1044_v3  ;;  %v331_v4 = vmul.f32 %v1524_v2, %v1378_v54  ;;  %v332_v15 = vmul.f32 %v1524_v2, %v1381_v58  ;;  %v333_v5 = vmul.f32 %v1524_v2, %v1382_v59 }
  0x5b   : > { %v1048_v6 = vsel %vm1005_vm7, %v1047_v53, %v1046_v0  ;;  %v361_v55 = vadd.f32 %v1533_v11, %v326_v63  ;;  %v362_v16 = vadd.f32 %v1533_v11, %v327_v1  ;;  %v363_v17 = vadd.f32 %v1533_v11, %v328_v12 }
  0x5c   : > { %v1106_v8 = vpack.c.b16 %v1048_v6, %v1034_v14  ;;  %v364_v60 = vadd.f32 %v1533_v11, %v329_v13  ;;  %v365_v9 = vadd.f32 %v1533_v11, %v330_v50  ;;  %v366_v7 = vadd.f32 %v1533_v11, %v331_v4 }
  0x5d   : > { %v367_v18 = vadd.f32 %v1533_v11, %v332_v15  ;;  %v368_v19 = vadd.f32 %v1533_v11, %v333_v5  ;;  %v393_v21 = vmax.f32 %v361_v55, 0.0  ;;  %v394_v22 = vmax.f32 %v362_v16, 0.0 }
  0x5e   : > { %1328 = vmatmul.msk.bf16.vlgmr.msra.gmra.mxu1 %vm1109_vm8, %v1106_v8  ;;  %v395_v23 = vmax.f32 %v363_v17, 0.0  ;;  %v396_v24 = vmax.f32 %v364_v60, 0.0  ;;  %v397_v26 = vmax.f32 %v365_v9, 0.0  ;;  %v398_v27 = vmax.f32 %v366_v7, 0.0 }
  0x5f   : > { %v399_v28 = vmax.f32 %v367_v18, 0.0  ;;  %v400_v29 = vmax.f32 %v368_v19, 0.0  ;;  %v1385_v32 = vunpack.c.l.bf16 %v1643_v20  ;;  %v1386_v33 = vunpack.c.h.bf16 %v1643_v20 }
  0x60   : > { %v417_v30 = vadd.f32 %v395_v23, %v393_v21  ;;  %v418_v31 = vadd.f32 %v396_v24, %v394_v22  ;;  %v1389_v36 = vunpack.c.l.bf16 %v1647_v25  ;;  %v1390_v37 = vunpack.c.h.bf16 %v1647_v25 }
  0x61   : > { %v419_v34 = vadd.f32 %v399_v28, %v397_v26  ;;  %v420_v35 = vadd.f32 %v400_v29, %v398_v27 }
  0x62   : > { %v465_v38 = vrot.slane %v417_v30, 2  ;;  %v466_v39 = vrot.slane %v417_v30, 4  ;;  %v467_v40 = vrot.slane %v417_v30, 6  ;;  %v468_v41 = vrot.slane %v418_v31, 2 }
  0x63   : > { %v469_v42 = vrot.slane %v418_v31, 4  ;;  %v470_v43 = vrot.slane %v418_v31, 6  ;;  %v471_v44 = vrot.slane %v419_v34, 2  ;;  %v472_v45 = vrot.slane %v419_v34, 4 }
  0x64   : > { %v473_v46 = vrot.slane %v419_v34, 6  ;;  %v474_v47 = vrot.slane %v420_v35, 2  ;;  %v475_v48 = vrot.slane %v420_v35, 4  ;;  %v476_v49 = vrot.slane %v420_v35, 6 }
  0x65   : > { %v1295_v51 = vrot.slane %v417_v30, 9  ;;  %v1296_v52 = vrot.slane %v465_v38, 9  ;;  %v1297_v53 = vrot.slane %v466_v39, 9  ;;  %v1298_v54 = vrot.slane %v467_v40, 9 }
  0x66   : > { %v1299_v56 = vrot.slane %v418_v31, 9  ;;  %v1300_v57 = vrot.slane %v468_v41, 9  ;;  %v1301_v58 = vrot.slane %v469_v42, 9  ;;  %v1302_v59 = vrot.slane %v470_v43, 9 }
  0x67   : > { %v1303_v61 = vrot.slane %v419_v34, 9  ;;  %v1304_v62 = vrot.slane %v471_v44, 9  ;;  %v1305_v63 = vrot.slane %v472_v45, 9  ;;  %v1306_v1 = vrot.slane %v473_v46, 9 }
  0x68   : > { %v1307_v10 = vrot.slane %v420_v35, 9  ;;  %v1308_v3 = vrot.slane %v474_v47, 9  ;;  %v1309_v12 = vrot.slane %v475_v48, 9  ;;  %v1310_v13 = vrot.slane %v476_v49, 9 }
  0x69   : > { %v761_v14 = vadd.f32 %v1295_v51, %v417_v30  ;;  %v762_v0 = vadd.f32 %v1296_v52, %v465_v38  ;;  %v763_v50 = vadd.f32 %v1297_v53, %v466_v39  ;;  %v764_v4 = vadd.f32 %v1298_v54, %v467_v40 }
  0x6a   : > { %v765_v6 = vadd.f32 %v1299_v56, %v418_v31  ;;  %v766_v15 = vadd.f32 %v1300_v57, %v468_v41  ;;  %v767_v5 = vadd.f32 %v1301_v58, %v469_v42  ;;  %v768_v55 = vadd.f32 %v1302_v59, %v470_v43 }
  0x6b   : > { %v769_v8 = vadd.f32 %v1303_v61, %v419_v34  ;;  %v770_v16 = vadd.f32 %v1304_v62, %v471_v44  ;;  %v771_v17 = vadd.f32 %v1305_v63, %v472_v45  ;;  %v772_v60 = vadd.f32 %v1306_v1, %v473_v46 }
  0x6c   : > { %v773_v9 = vadd.f32 %v1307_v10, %v420_v35  ;;  %v774_v7 = vadd.f32 %v1308_v3, %v474_v47  ;;  %v775_v18 = vadd.f32 %v1309_v12, %v475_v48  ;;  %v776_v19 = vadd.f32 %v1310_v13, %v476_v49 }
  0x6d   : > { %v825_v21 = vpack.c.bf16 %v761_v14, %v761_v14  ;;  %v826_v22 = vpack.c.bf16 %v762_v0, %v762_v0  ;;  %v827_v23 = vpack.c.bf16 %v763_v50, %v763_v50  ;;  %v828_v24 = vpack.c.bf16 %v764_v4, %v764_v4  ;;  %v1412_v14 = vld [vmem:[%s1519_s24 + $0x70] sm:$0xff]  }
  0x6e   : > { %v829_v26 = vpack.c.bf16 %v765_v6, %v765_v6  ;;  %v830_v27 = vpack.c.bf16 %v766_v15, %v766_v15  ;;  %v831_v28 = vpack.c.bf16 %v767_v5, %v767_v5  ;;  %v832_v29 = vpack.c.bf16 %v768_v55, %v768_v55  ;;  %v1413_v15 = vld [vmem:[%s1519_s24 + $0x78] sm:$0xff]  }
  0x6f   : > { %v833_v30 = vpack.c.bf16 %v769_v8, %v769_v8  ;;  %v834_v31 = vpack.c.bf16 %v770_v16, %v770_v16  ;;  %v835_v38 = vpack.c.bf16 %v771_v17, %v771_v17  ;;  %v836_v39 = vpack.c.bf16 %v772_v60, %v772_v60 }
  0x70   : > { %v837_v34 = vpack.c.bf16 %v773_v9, %v773_v9  ;;  %v838_v40 = vpack.c.bf16 %v774_v7, %v774_v7  ;;  %v839_v41 = vpack.c.bf16 %v775_v18, %v775_v18  ;;  %v840_v42 = vpack.c.bf16 %v776_v19, %v776_v19 }
  0x71   : > { %v954_v35 = vunpack.c.l.b16 %v825_v21  ;;  %v955_v43 = vunpack.c.l.b16 %v826_v22  ;;  %v956_v44 = vunpack.c.l.b16 %v827_v23  ;;  %v957_v45 = vunpack.c.l.b16 %v828_v24 }
  0x72   : > { %v958_v46 = vunpack.c.l.b16 %v829_v26  ;;  %v959_v47 = vunpack.c.l.b16 %v830_v27  ;;  %v960_v48 = vunpack.c.l.b16 %v831_v28  ;;  %v961_v49 = vunpack.c.l.b16 %v832_v29 }
  0x73   : > { %v962_v51 = vunpack.c.l.b16 %v833_v30  ;;  %v963_v52 = vunpack.c.l.b16 %v834_v31  ;;  %v964_v53 = vunpack.c.l.b16 %v835_v38  ;;  %v965_v54 = vunpack.c.l.b16 %v836_v39 }
  0x74   : > { %v966_v56 = vunpack.c.l.b16 %v837_v34  ;;  %v967_v57 = vunpack.c.l.b16 %v838_v40  ;;  %v968_v58 = vunpack.c.l.b16 %v839_v41  ;;  %v969_v59 = vunpack.c.l.b16 %v840_v42 }
  0x75   : > { %v1049_v61 = vrot.slane %v955_v43, 7  ;;  %v1051_v62 = vrot.slane %v956_v44, 6  ;;  %v1053_v63 = vrot.slane %v957_v45, 5  ;;  %v1055_v1 = vrot.slane %v958_v46, 4 }
  0x76   : > { %v1057_v10 = vrot.slane %v959_v47, 3  ;;  %v1059_v3 = vrot.slane %v960_v48, 2  ;;  %v1061_v12 = vrot.slane %v961_v49, 1  ;;  %v1063_v13 = vrot.slane %v963_v52, 7 }
  0x77   : > { %v1050_v0 = vsel %vm987_vm1, %v1049_v61, %v954_v35  ;;  %v1065_v50 = vrot.slane %v964_v53, 6  ;;  %v1067_v4 = vrot.slane %v965_v54, 5  ;;  %v1069_v6 = vrot.slane %v966_v56, 4 }
  0x78   : > { %v1052_v5 = vsel %vm990_vm2, %v1051_v62, %v1050_v0  ;;  %v1064_v55 = vsel %vm987_vm1, %v1063_v13, %v962_v51  ;;  %v1071_v8 = vrot.slane %v967_v57, 3  ;;  %v1073_v16 = vrot.slane %v968_v58, 2 }
  0x79   : > { %v1054_v17 = vsel %vm993_vm3, %v1053_v63, %v1052_v5  ;;  %v1066_v60 = vsel %vm990_vm2, %v1065_v50, %v1064_v55  ;;  %v1075_v9 = vrot.slane %v969_v59, 1  ;;  %v1393_v7 = vunpack.c.l.bf16 %v1412_v14 }
  0x7a   : > { %v1056_v18 = vsel %vm996_vm4, %v1055_v1, %v1054_v17  ;;  %v1068_v19 = vsel %vm993_vm3, %v1067_v4, %v1066_v60  ;;  %v1394_v21 = vunpack.c.h.bf16 %v1412_v14  ;;  %v1397_v22 = vunpack.c.l.bf16 %v1413_v15 }
  0x7b   : > { %v1058_v23 = vsel %vm999_vm5, %v1057_v10, %v1056_v18  ;;  %v1070_v24 = vsel %vm996_vm4, %v1069_v6, %v1068_v19  ;;  %v1398_v26 = vunpack.c.h.bf16 %v1413_v15  ;;  %v334_v27 = vmul.f32 %v1524_v2, %v1385_v32 }
  0x7c   : > { %v1060_v28 = vsel %vm1002_vm6, %v1059_v3, %v1058_v23  ;;  %v1072_v29 = vsel %vm999_vm5, %v1071_v8, %v1070_v24  ;;  %v335_v30 = vmul.f32 %v1524_v2, %v1386_v33  ;;  %v336_v31 = vmul.f32 %v1524_v2, %v1389_v36 }
  0x7d   : > { %v1062_v38 = vsel %vm1005_vm7, %v1061_v12, %v1060_v28  ;;  %v1074_v39 = vsel %vm1002_vm6, %v1073_v16, %v1072_v29  ;;  %v337_v32 = vmul.f32 %v1524_v2, %v1390_v37  ;;  %v338_v34 = vmul.f32 %v1524_v2, %v1393_v7 }
  0x7e   : > { %v1076_v40 = vsel %vm1005_vm7, %v1075_v9, %v1074_v39  ;;  %v339_v20 = vmul.f32 %v1524_v2, %v1394_v21  ;;  %v340_v33 = vmul.f32 %v1524_v2, %v1397_v22  ;;  %v341_v41 = vmul.f32 %v1524_v2, %v1398_v26 }
  0x7f   : > { %v1107_v42 = vpack.c.b16 %v1076_v40, %v1062_v38  ;;  %v369_v36 = vadd.f32 %v1533_v11, %v334_v27  ;;  %v370_v35 = vadd.f32 %v1533_v11, %v335_v30  ;;  %v371_v43 = vadd.f32 %v1533_v11, %v336_v31 }
  0x80   : > { %v372_v25 = vadd.f32 %v1533_v11, %v337_v32  ;;  %v373_v37 = vadd.f32 %v1533_v11, %v338_v34  ;;  %v374_v44 = vadd.f32 %v1533_v11, %v339_v20  ;;  %v375_v45 = vadd.f32 %v1533_v11, %v340_v33 }
  0x81   : > { %1329 = vmatmul.msk.bf16.vlgmr.msra.gmra.mxu2 %vm1109_vm8, %v1107_v42  ;;  %v376_v46 = vadd.f32 %v1533_v11, %v341_v41  ;;  %v401_v2 = vmax.f32 %v369_v36, 0.0  ;;  %v402_v47 = vmax.f32 %v370_v35, 0.0  ;;  %v403_v48 = vmax.f32 %v371_v43, 0.0 }
  0x82   : > { %v404_v49 = vmax.f32 %v372_v25, 0.0  ;;  %v405_v51 = vmax.f32 %v373_v37, 0.0  ;;  %v406_v52 = vmax.f32 %v374_v44, 0.0  ;;  %v407_v53 = vmax.f32 %v375_v45, 0.0 }
  0x83   : > { %v408_v54 = vmax.f32 %v376_v46, 0.0  ;;  %v421_v56 = vadd.f32 %v403_v48, %v401_v2 }
  0x84   : > { %v422_v57 = vadd.f32 %v404_v49, %v402_v47  ;;  %v423_v58 = vadd.f32 %v407_v53, %v405_v51 }
  0x85   : > { %v424_v59 = vadd.f32 %v408_v54, %v406_v52  ;;  %v477_v61 = vrot.slane %v421_v56, 2  ;;  %v478_v62 = vrot.slane %v421_v56, 4  ;;  %v479_v63 = vrot.slane %v421_v56, 6 }
  0x86   : > { %v480_v1 = vrot.slane %v422_v57, 2  ;;  %v481_v10 = vrot.slane %v422_v57, 4  ;;  %v483_v3 = vrot.slane %v423_v58, 2  ;;  %v482_v12 = vrot.slane %v422_v57, 6 }
  0x87   : > { %v484_v11 = vrot.slane %v423_v58, 4  ;;  %v485_v13 = vrot.slane %v423_v58, 6  ;;  %v486_v14 = vrot.slane %v424_v59, 2  ;;  %v487_v0 = vrot.slane %v424_v59, 4 }
  0x88   : > { %v1312_v50 = vrot.slane %v477_v61, 9  ;;  %v1313_v4 = vrot.slane %v478_v62, 9  ;;  %v488_v6 = vrot.slane %v424_v59, 6  ;;  %v1314_v15 = vrot.slane %v479_v63, 9 }
  0x89   : > { %v1315_v5 = vrot.slane %v422_v57, 9  ;;  %v1316_v55 = vrot.slane %v480_v1, 9  ;;  %v1311_v8 = vrot.slane %v421_v56, 9  ;;  %v1317_v16 = vrot.slane %v481_v10, 9 }
  0x8a   : > { %v1320_v17 = vrot.slane %v483_v3, 9  ;;  %v1321_v60 = vrot.slane %v484_v11, 9  ;;  %v1318_v9 = vrot.slane %v482_v12, 9  ;;  %v1319_v7 = vrot.slane %v423_v58, 9 }
  0x8b   : > { %v1322_v18 = vrot.slane %v485_v13, 9  ;;  %v1323_v19 = vrot.slane %v424_v59, 9  ;;  %v1324_v21 = vrot.slane %v486_v14, 9  ;;  %v1325_v22 = vrot.slane %v487_v0, 9 }
  0x8c   : > { %v778_v23 = vadd.f32 %v1312_v50, %v477_v61  ;;  %v779_v24 = vadd.f32 %v1313_v4, %v478_v62  ;;  %v1326_v26 = vrot.slane %v488_v6, 9  ;;  %v780_v27 = vadd.f32 %v1314_v15, %v479_v63 }
  0x8d   : > { %v781_v28 = vadd.f32 %v1315_v5, %v422_v57  ;;  %v782_v29 = vadd.f32 %v1316_v55, %v480_v1  ;;  %v777_v30 = vadd.f32 %v1311_v8, %v421_v56  ;;  %v783_v31 = vadd.f32 %v1317_v16, %v481_v10 }
  0x8e   : > { %v786_v38 = vadd.f32 %v1320_v17, %v483_v3  ;;  %v787_v39 = vadd.f32 %v1321_v60, %v484_v11  ;;  %v784_v32 = vadd.f32 %v1318_v9, %v482_v12  ;;  %v785_v34 = vadd.f32 %v1319_v7, %v423_v58 }
  0x8f   : > { %v788_v40 = vadd.f32 %v1322_v18, %v485_v13  ;;  %v789_v20 = vadd.f32 %v1323_v19, %v424_v59  ;;  %v790_v33 = vadd.f32 %v1324_v21, %v486_v14  ;;  %v791_v41 = vadd.f32 %v1325_v22, %v487_v0 }
  0x90   : > { %v842_v42 = vpack.c.bf16 %v778_v23, %v778_v23  ;;  %v843_v36 = vpack.c.bf16 %v779_v24, %v779_v24  ;;  %v792_v35 = vadd.f32 %v1326_v26, %v488_v6  ;;  %v844_v43 = vpack.c.bf16 %v780_v27, %v780_v27 }
  0x91   : > { %v845_v25 = vpack.c.bf16 %v781_v28, %v781_v28  ;;  %v846_v37 = vpack.c.bf16 %v782_v29, %v782_v29  ;;  %v841_v44 = vpack.c.bf16 %v777_v30, %v777_v30  ;;  %v847_v45 = vpack.c.bf16 %v783_v31, %v783_v31 }
  0x92   : > { %v850_v46 = vpack.c.bf16 %v786_v38, %v786_v38  ;;  %v851_v2 = vpack.c.bf16 %v787_v39, %v787_v39  ;;  %v848_v47 = vpack.c.bf16 %v784_v32, %v784_v32  ;;  %v849_v48 = vpack.c.bf16 %v785_v34, %v785_v34 }
  0x93   : > { %v852_v49 = vpack.c.bf16 %v788_v40, %v788_v40  ;;  %v853_v51 = vpack.c.bf16 %v789_v20, %v789_v20  ;;  %v854_v52 = vpack.c.bf16 %v790_v33, %v790_v33  ;;  %v855_v53 = vpack.c.bf16 %v791_v41, %v791_v41 }
  0x94   : > { %v971_v54 = vunpack.c.l.b16 %v842_v42  ;;  %v972_v56 = vunpack.c.l.b16 %v843_v36  ;;  %v856_v57 = vpack.c.bf16 %v792_v35, %v792_v35  ;;  %v973_v58 = vunpack.c.l.b16 %v844_v43 }
  0x95   : > { %v974_v59 = vunpack.c.l.b16 %v845_v25  ;;  %v975_v61 = vunpack.c.l.b16 %v846_v37  ;;  %v970_v62 = vunpack.c.l.b16 %v841_v44  ;;  %v976_v63 = vunpack.c.l.b16 %v847_v45 }
  0x96   : > { %v979_v1 = vunpack.c.l.b16 %v850_v46  ;;  %v980_v10 = vunpack.c.l.b16 %v851_v2  ;;  %v977_v3 = vunpack.c.l.b16 %v848_v47  ;;  %v978_v12 = vunpack.c.l.b16 %v849_v48 }
  0x97   : > { %v981_v11 = vunpack.c.l.b16 %v852_v49  ;;  %v982_v13 = vunpack.c.l.b16 %v853_v51  ;;  %v983_v14 = vunpack.c.l.b16 %v854_v52  ;;  %v1077_v0 = vrot.slane %v971_v54, 7 }
  0x98   : > { %v1079_v50 = vrot.slane %v972_v56, 6  ;;  %v1081_v4 = vrot.slane %v973_v58, 5  ;;  %v984_v6 = vunpack.c.l.b16 %v855_v53  ;;  %v985_v15 = vunpack.c.l.b16 %v856_v57 }
  0x99   : > { %v1083_v5 = vrot.slane %v974_v59, 4  ;;  %v1085_v55 = vrot.slane %v975_v61, 3  ;;  %v1078_v8 = vsel %vm987_vm1, %v1077_v0, %v970_v62  ;;  %v1091_v16 = vrot.slane %v979_v1, 7 }
  0x9a   : > { %v1093_v17 = vrot.slane %v980_v10, 6  ;;  %v1095_v60 = vrot.slane %v981_v11, 5  ;;  %v1080_v9 = vsel %vm990_vm2, %v1079_v50, %v1078_v8  ;;  %v1087_v7 = vrot.slane %v976_v63, 2 }
  0x9b   : > { %v1097_v18 = vrot.slane %v982_v13, 4  ;;  %v1082_v19 = vsel %vm993_vm3, %v1081_v4, %v1080_v9  ;;  %v1089_v21 = vrot.slane %v977_v3, 1  ;;  %v1092_v22 = vsel %vm987_vm1, %v1091_v16, %v978_v12 }
  0x9c   : > { %v1099_v23 = vrot.slane %v983_v14, 3  ;;  %v1084_v24 = vsel %vm996_vm4, %v1083_v5, %v1082_v19  ;;  %v1094_v26 = vsel %vm990_vm2, %v1093_v17, %v1092_v22  ;;  %v1101_v27 = vrot.slane %v984_v6, 2 }
  0x9d   : > { %v1086_v28 = vsel %vm999_vm5, %v1085_v55, %v1084_v24  ;;  %v1096_v29 = vsel %vm993_vm3, %v1095_v60, %v1094_v26  ;;  %v1103_v30 = vrot.slane %v985_v15, 1 }
  0x9e   : > { %v1088_v31 = vsel %vm1002_vm6, %v1087_v7, %v1086_v28  ;;  %v1098_v38 = vsel %vm996_vm4, %v1097_v18, %v1096_v29 }
  0x9f   : > { %v1090_v39 = vsel %vm1005_vm7, %v1089_v21, %v1088_v31  ;;  %v1100_v32 = vsel %vm999_vm5, %v1099_v23, %v1098_v38 }
  0xa0   : > { %v1102_v34 = vsel %vm1002_vm6, %v1101_v27, %v1100_v32 }
  0xa1   : > { %v1104_v40 = vsel %vm1005_vm7, %v1103_v30, %v1102_v34 }
  0xa2   : > { %v1108_v20 = vpack.c.b16 %v1104_v40, %v1090_v39 }
  0xa4   : > { %1330 = vmatmul.msk.bf16.vlgmr.msra.gmra.mxu3 %vm1109_vm8, %v1108_v20 }
  0xb6   : > { %v1135_v33 = vpop.f32.mrf.mxu0 }
  0xb7   : > { %1156 = vst.msk [vmem:[%s238_s6] sm:$0xff] %vm1155_vm9, %v1135_v33 }
  0xbe   : > { %v1137_v36 = vpop.f32.mrf.mxu0 }
  0xbf   : > { %1157 = vst.msk [vmem:[%s238_s6 + $0x8] sm:$0xff] %vm1155_vm9, %v1137_v36 }
  0xdb   : > { %v1140_v41 = vpop.f32.mrf.mxu1 }
  0xdc   : > { %1158 = vst.msk [vmem:[%s238_s6 + $0x10] sm:$0xff] %vm1155_vm9, %v1140_v41 }
  0xe3   : > { %v1142_v35 = vpop.f32.mrf.mxu1 }
  0xe4   : > { %1159 = vst.msk [vmem:[%s238_s6 + $0x18] sm:$0xff] %vm1155_vm9, %v1142_v35 }
 0x104   : > { %v1145_v42 = vpop.f32.mrf.mxu2 }
 0x105   : > { %1160 = vst.msk [vmem:[%s238_s6 + $0x20] sm:$0xff] %vm1155_vm9, %v1145_v42 }
 0x10c   : > { %v1147_v43 = vpop.f32.mrf.mxu2 }
 0x10d   : > { %1161 = vst.msk [vmem:[%s238_s6 + $0x28] sm:$0xff] %vm1155_vm9, %v1147_v43 }
 0x127   : > { %v1150_v25 = vpop.f32.mrf.mxu3 }
 0x128   : > { %1162 = vst.msk [vmem:[%s238_s6 + $0x30] sm:$0xff] %vm1155_vm9, %v1150_v25 }
 0x12f   : > { %v1152_v37 = vpop.f32.mrf.mxu3 }
 0x130   : > { %1163 = vst.msk [vmem:[%s238_s6 + $0x38] sm:$0xff] %vm1155_vm9, %v1152_v37 }
 0x131 PF: > { %s14_s17 = sadd.s32 1, %s1465_s17   ;;  %s1735_s15 = smov %s1461_s16 }
 0x132   : > { %p11_p5 = scmp.ge.s32.totalorder %s14_s17, 4   ;;  %s1736_s16 = smov %s1738_s18 }
 0x134   :  { %13 = sbr.rel (!%p11_p5) target bundleno = 2 (0x2), region = 66 }

</bundles_post_ra>
